<compile_context>
chip_gen: v6e
topology: v6e:2x2x1
jax: 0.10.0
libtpu: 0.0.40
codegen_flags: <defaults>
</compile_context>

<pallas_src>
import jax
import jax.numpy as jnp
from jax.experimental import pallas as pl
from jax.experimental.pallas import tpu as pltpu


def _copy_kernel(x_ref, o_ref):
    # Identity copy of one (TR, TL) tile; the chomp is expressed entirely by
    # the grid extent + Pallas boundary masking on the final output tile.
    o_ref[...] = x_ref[...]


_MAX_LANE_TILE = 2048     # lanes per tile (multiple of 128)
_MIN_GRID_STEPS = 4       # ensure the software pipeline actually overlaps


def _vmem_budget():
    """Returns (per-tile byte budget, scoped vmem_limit_bytes) per chip family."""
    try:
        cap = getattr(pltpu.get_tpu_info(), "vmem_capacity_bytes", None)
    except Exception:
        cap = None
    if cap is not None and cap >= 96 * 1024 * 1024:
        # 128 MiB parts (v5e / v6e): bigger tiles halve per-step overhead.
        return 8 * 1024 * 1024, 64 * 1024 * 1024
    # 64 MiB-per-TC parts (v7x) or unknown: stay conservative so
    # double-buffered in+out plus compiler scratch never OOMs.
    return 4 * 1024 * 1024, 32 * 1024 * 1024


def chomp1d(x: jax.Array, chomp_size: int) -> jax.Array:
    """Pallas implementation of Chomp1d.forward: x[:, :, :-chomp_size]."""
    assert x.ndim == 3, "expected (N, C, L) input"
    n, c, l = x.shape
    # TODO(synk): PyTorch Chomp1d with chomp_size == 0 degenerates to an empty
    # slice (x[:, :, :0]); that degenerate case is intentionally not supported.
    assert 0 < chomp_size < l, "chomp_size must be in (0, L)"
    l_out = l - chomp_size

    # Sub-128-lane outputs are better served by XLA's fused slice than by a
    # masked-store Pallas memcpy (also guards huge-L / tiny-l_out VMEM blowup).
    if l_out < 128:
        return x[:, :, :l_out]

    rows = n * c
    x2 = x.reshape(rows, l)

    itemsize = jnp.dtype(x.dtype).itemsize
    sub = max(8, 32 // itemsize)  # sublane packing: 8 f32 / 16 bf16 / 32 int8
    tile_budget, vmem_limit = _vmem_budget()

    # Balanced lane tile: 128-multiple, near-equal chunks, <= _MAX_LANE_TILE,
    # so the final lane tile is never mostly masked / over-read.
    lane_blocks = pl.cdiv(l_out, 128)
    n_lane_tiles = pl.cdiv(l_out, _MAX_LANE_TILE)
    tl = 128 * pl.cdiv(lane_blocks, n_lane_tiles)

    # Row tile: multiple of the sublane packing, capped by the tile budget.
    if rows <= sub:
        tr = rows                               # == full array dim, always legal
    else:
        max_tr = max(sub, tile_budget // (tl * itemsize))
        tr = max(sub, (min(rows, max_tr) // sub) * sub)

    # Guarantee enough grid steps for read(i+1)/write(i-1) overlap (and for
    # megacore sharding); shrink tiles while preserving 128/sublane multiples.
    n_row, n_lane = pl.cdiv(rows, tr), pl.cdiv(l_out, tl)
    while n_row * n_lane < _MIN_GRID_STEPS:
        if tr > sub:
            tr = max(sub, ((tr // 2) // sub) * sub)
        elif tl > 128:
            tl = max(128, ((tl // 2) // 128) * 128)
        else:
            break
        n_row, n_lane = pl.cdiv(rows, tr), pl.cdiv(l_out, tl)

    # v7x megacore: best-effort even step count on the leading parallel axis so
    # both TensorCores get equal work (near-neutral on single-TC v5e/v6e).
    if n_row > 1 and n_row % 2 == 1:
        cand = pl.cdiv(pl.cdiv(rows, n_row + 1), sub) * sub
        if cand >= sub and pl.cdiv(rows, cand) % 2 == 0:
            tr, n_row = cand, pl.cdiv(rows, cand)
    elif n_row == 1 and n_lane > 1 and n_lane % 2 == 1:
        cand = 128 * pl.cdiv(pl.cdiv(l_out, 128), n_lane + 1)
        if cand >= 128 and pl.cdiv(l_out, cand) % 2 == 0:
            tl, n_lane = cand, pl.cdiv(l_out, cand)

    # Reads cover l_out plus (at most) the chomped tail touched by the final
    # lane tile; writes cover exactly l_out.
    read_lanes = min(l, n_lane * tl)
    cost = pl.CostEstimate(
        flops=0,
        transcendentals=0,
        bytes_accessed=rows * (read_lanes + l_out) * itemsize,
    )

    out2 = pl.pallas_call(
        _copy_kernel,
        out_shape=jax.ShapeDtypeStruct((rows, l_out), x.dtype),
        grid=(n_row, n_lane),
        in_specs=[pl.BlockSpec((tr, tl), lambda i, j: (i, j))],
        out_specs=pl.BlockSpec((tr, tl), lambda i, j: (i, j)),
        compiler_params=pltpu.CompilerParams(
            dimension_semantics=("parallel", "parallel"),
            vmem_limit_bytes=vmem_limit,
        ),
        cost_estimate=cost,
    )(x2)
    return out2.reshape(n, c, l_out)


if __name__ == "__main__":
    # Chomp1d has no parameters; only the chomp_size hyperparameter.
    chomp_size = 3
    key = jax.random.PRNGKey(0)

    # TCN-style (N, C, L) activation with L large enough to take the Pallas
    # path (ragged l_out exercises the boundary-masked final lane tile).
    x = jax.random.normal(key, (2, 4, 300), dtype=jnp.float32)
    y = jax.block_until_ready(chomp1d(x, chomp_size))
    ref = x[:, :, :-chomp_size]
    assert y.shape == ref.shape, (y.shape, ref.shape)
    assert y.dtype == ref.dtype
    assert bool(jnp.array_equal(y, ref))

    # Multi-tile path on both grid axes (still small: 2*8*1024 f32 = 64 KiB).
    x2 = jax.random.normal(jax.random.PRNGKey(1), (2, 8, 1024), dtype=jnp.float32)
    y2 = jax.block_until_ready(chomp1d(x2, 4))
    assert bool(jnp.array_equal(y2, x2[:, :, :-4]))

    # Sub-128-lane outputs route to XLA's fused slice (per perf review).
    x3 = jax.random.normal(jax.random.PRNGKey(2), (2, 4, 16), dtype=jnp.float32)
    y3 = jax.block_until_ready(chomp1d(x3, chomp_size))
    assert bool(jnp.array_equal(y3, x3[:, :, :-chomp_size]))

    print("KERNEL_OK")
</pallas_src>

<mosaic_0001>
module attributes {stable_mosaic.version = 11 : i64} {
  func.func @_copy_kernel(%arg0: i32, %arg1: i32, %arg2: memref<8x128xf32, #tpu.memory_space<vmem>>, %arg3: memref<8x128xf32, #tpu.memory_space<vmem>>) attributes {dimension_semantics = [#tpu.dimension_semantics<parallel>, #tpu.dimension_semantics<parallel>], iteration_bounds = array<i64: 1, 3>, scalar_prefetch = 0 : i64, scratch_operands = 0 : i64, tpu.core_type = #tpu.core_type<tc>, window_params = [{transform_indices = @transform_0, window_bounds = array<i64: 8, 128>}, {transform_indices = @transform_1, window_bounds = array<i64: 8, 128>}]} {
    %c0 = arith.constant 0 : index
    %c0_0 = arith.constant 0 : index
    %0 = vector.load %arg2[%c0, %c0_0] : memref<8x128xf32, #tpu.memory_space<vmem>>, vector<8x128xf32>
    %c0_1 = arith.constant 0 : index
    %c0_2 = arith.constant 0 : index
    %1 = vector.load %arg3[%c0_1, %c0_2] : memref<8x128xf32, #tpu.memory_space<vmem>>, vector<8x128xf32>
    tpu.vector_store %arg3[%c0_1, %c0_2], %0 {strides = array<i32>} : memref<8x128xf32, #tpu.memory_space<vmem>>, vector<8x128xf32>,
    return
  }
  func.func @transform_0(%arg0: i32, %arg1: i32) -> (i32, i32) {
    %c0_i32 = arith.constant 0 : i32
    return %arg0, %arg1 : i32, i32
  }
  func.func @transform_1(%arg0: i32, %arg1: i32) -> (i32, i32) {
    %c0_i32 = arith.constant 0 : i32
    return %arg0, %arg1 : i32, i32
  }
}

</mosaic_0001>

<bundles_post_ra>
// kernel: tpu_custom_call.1
= control target key start
LH: loop header
LB: loop body
LE: loop exit
PB: predicated region body
PF: predicated region fallthrough
CT: control target
= control target key end

     0   :  { %6 = vsyncpa [#allocation3], 0  ;;  %s585_s0 = inlined_call_operand.hbm [shape: f32[8,300], index: 0, kind: input, shape index: {}]   ;;  %s586_s1 = inlined_call_operand.hbm [shape: f32[8,297], index: 1, kind: output, shape index: {}]  }
   0x1   :  { %8 = vsyncpa [#allocation3 + $0x1], 0 }
   0x2   :  { %9 = vsyncpa [#allocation4], 0 }
   0x3   :  { %11 = vsyncpa [#allocation4 + $0x1], 0  ;;  %s447_s6 = smov 0   ;;  %s449_s7 = smov 0  }
   0x4   :  { %s451_s8 = smov 0   ;;  %s453_s9 = smov 0  }
   0x5   :  { %s455_s10 = smov 0   ;;  %s457_s11 = smov 0  }
   0x6 LB: > { %s250_s12 = sadd.s32 4294967295, %s433_s11   ;;  %s251_s13 = sadd.s32 4294967294, %s433_s11   ;;  %s433_s11 = sphi %s457_s11, %s17_s11   ;;  %s429_s10 = sphi %s455_s10, %s597_s10   ;;  %s425_s9 = sphi %s453_s9, %s596_s9   ;;  %s421_s8 = sphi %s451_s8, %s595_s8   ;;  %s417_s7 = sphi %s449_s7, %s594_s7   ;;  %s413_s6 = sphi %s447_s6, %s593_s6  }
   0x7   : > { %s26_s14 = sadd.s32 1, %s429_s10  ;;  %s38_s15 = sadd.s32 1, %s421_s8 }
   0x8   : > { %p27_p0 = scmp.ge.s32.totalorder %s26_s14, 3  ;;  %p45_p1 = scmp.ne.s32.totalorder %s421_s8, %s417_s7 }
   0x9   : > { %p46_p2 = scmp.eq.s32.totalorder %s433_s11, 0  ;;  %p51_p3 = scmp.ne.s32.totalorder %s417_s7, %s413_s6 }
   0xa   : > { %s599_s14 = smov (%p27_p0, %s26_s14), 0  ;;  %p52_p5 = scmp.eq.s32.totalorder %s250_s12, 0 }
   0xb   : > { %p488_p4 = por %p46_p2, %p45_p1  ;;  %s34_s17 = ssub.s32 %s429_s10, %s599_s14 }
   0xc   : > { %p77_p6 = scmp.eq.s32.totalorder %s250_s12, 2  ;;  %p36_p7 = scmp.eq.s32.totalorder %s34_s17, 0 }
   0xd   : > { %p494_p8 = por %p52_p5, %p51_p3  ;;  %p83_p10 = scmp.eq.s32.totalorder %s251_s13, 2 }
   0xe   : > { %p498_p9 = por %p77_p6, %p45_p1  ;;  %p275_p12 = scmp.lt.s32.totalorder %s433_s11, 3 }
   0xf   : > { %s503_s20 = scalar_select %p36_p7, %s421_s8, %s38_s15  }
  0x10   : > { %p505_p11 = por %p83_p10, %p51_p3  ;;  %s103_s22 = sand.u32 1, %s421_s8  }
  0x11   : > { %s254_s23 = sshll.u32 %s103_s22, 3  ;;  %s255_s24 = sshll.u32 %s429_s10, 7 }
  0x12   : > { %s590_s21 = scalar_select %p505_p11, 1, 0 }
  0x13   : > { %s114_s27 = scalar_lea.hbm %s585_s0, %s255_s24  ;;  %s107_s28 = scalar_lea.vmem [#allocation2], %s254_s23 }
  0x14   : > { %s116_s29 = sshll.u32 %s107_s28, 4  ;;  %p517_p13 = pnand %p275_p12, %p488_p4  ;;  %s117_s29 = int_to_ptr.vmem [resolvable:$true] %s116_s29 }
  0x15   : > { %p256_p0 = scmp.ge.s32.totalorder %s433_s11, 1  ;;  %p121_p1 = scmp.lt.s32.totalorder %s433_s11, 4 }
  0x16   : > { %s104_s2 = scalar_lea.sflag [#allocation3], %s103_s22  ;;  %p327_p2 = pneg %p517_p13 }
  0x17   : > { %s338_s3 = scalar_lea.vmem %s117_s29, 128  ;;  %s435_s4 = smov [#allocation2]  }
  0x18   : > { %p339_p3 = scmp.ne.s32.totalorder %s117_s29, %s338_s3  ;;  %s343_s5 = sshll.u32 %s435_s4, 4  ;;  %s344_s5 = int_to_ptr.vmem [resolvable:$false] %s343_s5 }
  0x19   : > { %s345_s12 = scalar_lea.vmem %s344_s5, 256  ;;  %p346_p7 = scmp.lt.s32.totalorder %s117_s29, %s344_s5 }
  0x1a   : > { %p341_p5 = pnand %p339_p3, %p327_p2  ;;  %p347_p10 = scmp.lt.s32.totalorder %s345_s12, %s338_s3 }
  0x1c   : > { %p342_p6 = pneg %p341_p5  ;;  %p348_p4 = por %p347_p10, %p346_p7 }
  0x1e   : > { %p349_p12 = pnand %p348_p4, %p342_p6 }
  0x20   : > { %352 = shalt.err (!%p349_p12)
}
  0x21   : > { %270 = dma.hbm_to_vmem [thread:$0]  (!%p517_p13), %s114_s27, 128, %s117_s29, %s104_s2  }
  0x22   : > { %p122_p11 = pnand %p256_p0, %p121_p1 }
  0x23   : > { %s532_s13 = sand.u32 (!%p122_p11), 1, %s417_s7  }
  0x24   : > { %125 = sbr.rel (%p122_p11) target bundleno = 66 (0x42), region = 24  ;;  %s257_s15 = sshll.u32 (!%p122_p11), %s532_s13, 3 }
  0x25   : > { %s128_s16 = scalar_lea.sflag (!%p122_p11), [#allocation3], %s532_s13  ;;  %s131_s17 = scalar_lea.vmem (!%p122_p11), [#allocation2], %s257_s15 }
  0x29   : > { %404 = dma.done.wait (%p494_p8), %s128_s16, 128  }
  0x2a   : > { %406 = vsyncadd (%p494_p8), %s128_s16, 4294967168  ;;  %s149_s22 = scalar_lea.vmem [#allocation5], %s257_s15  ;;  %s260_s24 = sshll.u32 %s425_s9, 7  ;;  %v150_v0 = vld [vmem:[%s131_s17] sm:$0xff] }
  0x2b   : > { %s168_s23 = sshll.u32 %s149_s22, 4  ;;  %s166_s27 = scalar_lea.hbm %s586_s1, %s260_s24  ;;  %151 = vst [vmem:[%s149_s22] sm:$0xff] %v150_v0  ;;  %s541_s23 = int_to_ptr.vmem [resolvable:$true] %s168_s23 }
  0x2c   : > { %s153_s28 = scalar_lea.sflag [#allocation4], %s532_s13  ;;  %s353_s18 = scalar_lea.vmem %s541_s23, 128 }
  0x2d   : > { %p354_p8 = scmp.ne.s32.totalorder %s541_s23, %s353_s18  ;;  %s436_s29 = smov [#allocation5]  }
  0x2e   : > { %s357_s30 = sshll.u32 %s436_s29, 4  ;;  %s358_s30 = int_to_ptr.vmem [resolvable:$false] %s357_s30 }
  0x2f   : > { %p355_p11 = pnand %p354_p8, %p498_p9  ;;  %s359_s9 = scalar_lea.vmem %s358_s30, 256 }
  0x30   : > { %p360_p0 = scmp.lt.s32.totalorder %s541_s23, %s358_s30  ;;  %p361_p1 = scmp.lt.s32.totalorder %s359_s9, %s353_s18 }
  0x31   : > { %p356_p13 = pneg %p355_p11 }
  0x32   : > { %p362_p2 = por %p361_p1, %p360_p0 }
  0x34   : > { %p363_p3 = pnand %p362_p2, %p356_p13 }
  0x36   : > { %366 = shalt.err (!%p363_p3)
}
  0x37   : > { %s367_s2 = scalar_lea.hbm %s166_s27, 128  ;;  %s371_s5 = scalar_lea.hbm %s586_s1, 384 }
  0x38   : > { %p368_p5 = scmp.ne.s32.totalorder %s166_s27, %s367_s2  ;;  %p372_p10 = scmp.lt.s32.totalorder %s166_s27, %s586_s1 }
  0x39   : > { %p373_p4 = scmp.lt.s32.totalorder %s371_s5, %s367_s2 }
  0x3a   : > { %p369_p6 = pnand %p368_p5, %p498_p9 }
  0x3b   : > { %p374_p12 = por %p373_p4, %p372_p10 }
  0x3c   : > { %p370_p7 = pneg %p369_p6 }
  0x3e   : > { %p375_p8 = pnand %p374_p12, %p370_p7 }
  0x40   : > { %378 = shalt.err (!%p375_p8)
}
  0x41   : > { %265 = dma.vmem_to_hbm [thread:$0]  (%p498_p9), %s541_s23, 128, %s166_s27, %s153_s28  }
  0x42 PF: > { %p276_p11 = scmp.ge.s32.totalorder %s433_s11, 2  ;;  %s180_s15 = sand.u32 1, %s413_s6  }
  0x43   : > { %p592_p13 = scmp.ne.s32.totalorder %s590_s21, 0  ;;  %s181_s16 = scalar_lea.sflag [#allocation4], %s180_s15 }
  0x45   : > { %p272_p0 = pnand %p276_p11, %p592_p13 }
  0x47   : > { %p273_p1 = pneg %p272_p0 }
  0x49   : > { %408 = dma.done.wait (%p273_p1), %s181_s16, 128  }
  0x4a   : > { %410 = vsyncadd (%p273_p1), %s181_s16, 4294967168  ;;  %s17_s11 = sadd.s32 1, %s433_s11   ;;  %s593_s6 = smov %s417_s7 }
  0x4b   : > { %p14_p2 = scmp.ge.s32.totalorder %s17_s11, 5   ;;  %s594_s7 = smov %s421_s8 }
  0x4c   : > { %s595_s8 = smov %s503_s20  ;;  %s596_s9 = smov %s429_s10 }
  0x4d   : > { %s597_s10 = smov %s599_s14  ;;  %16 = sbr.rel (!%p14_p2) target bundleno = 6 (0x6), region = 69 }
  0x52   :  { %186 = vsyncpa [#allocation3], 1 }
  0x53   :  { %188 = vsyncpa [#allocation3 + $0x1], 1 }
  0x54   :  { %189 = vsyncpa [#allocation4], 1 }
  0x55   :  { %191 = vsyncpa [#allocation4 + $0x1], 1 }

</bundles_post_ra>
